<compile_context>
chip_gen: v7x
topology: tpu7x:2x2x1
jax: 0.10.0
libtpu: 0.0.40
codegen_flags: <defaults>
</compile_context>

<pallas_src>
import jax
import jax.numpy as jnp
from jax.experimental import pallas as pl
from jax.experimental.pallas import tpu as pltpu

N_UNITS = 100            # input_dim  (vocabulary size V)
INPUT_SIZE = 32          # chosen small value for the undefined `input_size`
EMB_DIM = INPUT_SIZE + 1 # output_dim D
MAX_NORM = 1.0
RENORM_EPS = 1e-7        # matches torch.embedding_renorm_

V_PAD = 128              # padded vocab   -> one clean 128-deep MXU contraction
D_PAD = 128              # padded emb dim -> lane-dense output stores
TILE_N_MAX = 2048        # tokens per grid step


def _round_up(x, m):
    return (x + m - 1) // m * m


def _choose_tile_n(n, tile_max=TILE_N_MAX):
    """Pick a tile size (multiple of 8) minimizing last-tile padding waste."""
    n8 = _round_up(max(n, 1), 8)
    best_t, best_waste = 8, None
    for t in (2048, 1024, 512, 256, 128, 64, 32, 16, 8):
        if t > tile_max:
            continue
        waste = _round_up(n8, t) - n8
        if best_waste is None or waste < best_waste:
            best_waste, best_t = waste, t
    return best_t


def prepare_weight(weight):
    """One-time table prep (pure JAX): L1 max-norm renorm + bf16 hi/lo split
    + zero padding to (V_PAD, D_PAD).  Zero pad rows/cols are inert."""
    w = weight.astype(jnp.float32)
    l1 = jnp.sum(jnp.abs(w), axis=1, keepdims=True)
    scale = jnp.where(l1 > MAX_NORM, MAX_NORM / (l1 + RENORM_EPS), 1.0)
    w_rn = w * scale                                           # [V, D] f32

    w_hi = w_rn.astype(jnp.bfloat16)
    w_lo = (w_rn - w_hi.astype(jnp.float32)).astype(jnp.bfloat16)

    V, D = weight.shape
    w_hi_pad = jnp.zeros((V_PAD, D_PAD), jnp.bfloat16).at[:V, :D].set(w_hi)
    w_lo_pad = jnp.zeros((V_PAD, D_PAD), jnp.bfloat16).at[:V, :D].set(w_lo)
    return w_hi_pad, w_lo_pad


def _embedding_kernel(idx_ref, w_hi_ref, w_lo_ref, out_ref):
    """One token tile of the embedding gather.

    idx_ref  : int32 [1, 1, TILE_N]     lane-major lookup indices
    w_hi_ref : bf16  [V_PAD, D_PAD]     hi part of renormalized table (resident)
    w_lo_ref : bf16  [V_PAD, D_PAD]     lo part (residual), resident
    out_ref  : f32   [TILE_N, D_PAD]    gathered embeddings
    """
    idx = idx_ref[0]                                           # [1, TILE_N]
    tile_n = idx.shape[1]

    # Transposed one-hot: sublane broadcast of the lane-vector of indices
    # against a sublane iota -- no transpose / XLU shuffle of the indices.
    rows = jax.lax.broadcasted_iota(jnp.int32, (V_PAD, tile_n), dimension=0)
    one_hot_t = (rows == idx).astype(jnp.bfloat16)             # [V_PAD, TILE_N]

    # Contract dim 0 of both operands: out[n, d] = sum_v oh[v, n] * w[v, d].
    dn = (((0,), (0,)), ((), ()))
    hi = jax.lax.dot_general(one_hot_t, w_hi_ref[...], dn,
                             preferred_element_type=jnp.float32)
    lo = jax.lax.dot_general(one_hot_t, w_lo_ref[...], dn,
                             preferred_element_type=jnp.float32)
    out_ref[...] = hi + lo                                     # [TILE_N, D_PAD]


def embedding_forward(x, w_hi_pad, w_lo_pad, *, tile_n_max=TILE_N_MAX):
    """x: int [B, S]; prepared tables: bf16 [V_PAD, D_PAD] -> f32 [B, S, EMB_DIM]."""
    B, S = x.shape
    N = B * S

    tile_n = _choose_tile_n(N, tile_n_max)
    n_pad = _round_up(N, tile_n)
    num_tiles = n_pad // tile_n

    # Lane-major index layout: (num_tiles, 1, tile_n).  Pad slots point at
    # row 0; their outputs are sliced away below.
    idx_flat = jnp.zeros((n_pad,), jnp.int32).at[:N].set(
        x.reshape(N).astype(jnp.int32))
    idx = idx_flat.reshape(num_tiles, 1, tile_n)

    out_flat = pl.pallas_call(
        _embedding_kernel,
        out_shape=jax.ShapeDtypeStruct((n_pad, D_PAD), jnp.float32),
        grid_spec=pltpu.PrefetchScalarGridSpec(
            num_scalar_prefetch=0,
            grid=(num_tiles,),
            in_specs=[
                # per-tile lane-major indices (pipelined, ~4B/token)
                pl.BlockSpec((1, 1, tile_n), lambda i: (i, 0, 0)),
                # full tables, same block every step -> resident in VMEM
                pl.BlockSpec((V_PAD, D_PAD), lambda i: (0, 0)),
                pl.BlockSpec((V_PAD, D_PAD), lambda i: (0, 0)),
            ],
            out_specs=pl.BlockSpec((tile_n, D_PAD), lambda i: (i, 0)),
        ),
        compiler_params=pltpu.CompilerParams(
            dimension_semantics=("parallel",)),
    )(idx, w_hi_pad, w_lo_pad)

    # Module parity: return the 33-wide feature dim.  For large N this slice
    # is a second full HBM pass; skip it if the consumer accepts D_PAD lanes.
    return out_flat[:N, :EMB_DIM].reshape(B, S, EMB_DIM)


def reference_forward(x, weight):
    """Pure-JAX reference (mirrors PyTorch nn.Embedding w/ max_norm=1, p=1)."""
    l1 = jnp.sum(jnp.abs(weight), axis=1, keepdims=True)
    scale = jnp.where(l1 > MAX_NORM, MAX_NORM / (l1 + RENORM_EPS), 1.0)
    w_rn = weight * scale
    return jnp.take(w_rn, x, axis=0)


if __name__ == "__main__":
    key = jax.random.PRNGKey(0)
    k_w, k_x = jax.random.split(key)

    # Deterministic parameter init (nn.Embedding default is N(0,1)).
    weight = jax.random.normal(k_w, (N_UNITS, EMB_DIM), dtype=jnp.float32)

    # Small example input: batch=2, seq=8 of token indices in [0, 100).
    B, S = 2, 8
    x = jax.random.randint(k_x, (B, S), minval=0, maxval=N_UNITS,
                           dtype=jnp.int32)

    # Table prep happens once (static parameter), not per forward call.
    w_hi_pad, w_lo_pad = prepare_weight(weight)

    out = embedding_forward(x, w_hi_pad, w_lo_pad)
    jax.block_until_ready(out)

    ref = reference_forward(x, weight)
    assert out.shape == (B, S, EMB_DIM)
    assert jnp.allclose(out, ref, atol=1e-5, rtol=1e-5)

    print("KERNEL_OK")
</pallas_src>

<mosaic_0001>
module attributes {stable_mosaic.version = 11 : i64} {
  func.func @_embedding_kernel(%arg0: i32, %arg1: memref<1x1x16xi32, #tpu.memory_space<vmem>>, %arg2: memref<128x128xbf16, #tpu.memory_space<vmem>>, %arg3: memref<128x128xbf16, #tpu.memory_space<vmem>>, %arg4: memref<16x128xf32, #tpu.memory_space<vmem>>) attributes {dimension_semantics = [#tpu.dimension_semantics<parallel>], iteration_bounds = array<i64: 1>, scalar_prefetch = 0 : i64, scratch_operands = 0 : i64, tpu.core_type = #tpu.core_type<tc>, window_params = [{transform_indices = @transform_0, window_bounds = array<i64: 1, 1, 16>}, {pipeline_mode = #tpu.pipeline_mode<synchronous>, transform_indices = @transform_1, window_bounds = array<i64: 128, 128>}, {pipeline_mode = #tpu.pipeline_mode<synchronous>, transform_indices = @transform_2, window_bounds = array<i64: 128, 128>}, {transform_indices = @transform_3, window_bounds = array<i64: 16, 128>}]} {
    %c0 = arith.constant 0 : index
    %c0_0 = arith.constant 0 : index
    %c0_1 = arith.constant 0 : index
    %0 = vector.load %arg1[%c0, %c0_0, %c0_1] : memref<1x1x16xi32, #tpu.memory_space<vmem>>, vector<1x1x16xi32>
    %1 = vector.shape_cast %0 : vector<1x1x16xi32> to vector<1x16xi32>
    %2 = tpu.iota {dimensions = array<i32: 0>} : vector<128x16xi32>
    %3 = vector.broadcast %1 : vector<1x16xi32> to vector<128x16xi32>
    %4 = arith.cmpi eq, %2, %3 : vector<128x16xi32>
    %5 = arith.extui %4 : vector<128x16xi1> to vector<128x16xi32>
    %6 = arith.sitofp %5 : vector<128x16xi32> to vector<128x16xf32>
    %7 = arith.truncf %6 : vector<128x16xf32> to vector<128x16xbf16>
    %c0_2 = arith.constant 0 : index
    %c0_3 = arith.constant 0 : index
    %8 = vector.load %arg2[%c0_2, %c0_3] : memref<128x128xbf16, #tpu.memory_space<vmem>>, vector<128x128xbf16>
    %cst = arith.constant dense<0.000000e+00> : vector<16x128xf32>
    %9 = tpu.matmul %7, %8, %cst {dimension_numbers = #tpu.dot_dimension_numbers<[0], [0], [1], [1], [0, 1, 1, 1], [], []>} : vector<128x16xbf16>, vector<128x128xbf16>, vector<16x128xf32> -> vector<16x128xf32>
    %c0_4 = arith.constant 0 : index
    %c0_5 = arith.constant 0 : index
    %10 = vector.load %arg3[%c0_4, %c0_5] : memref<128x128xbf16, #tpu.memory_space<vmem>>, vector<128x128xbf16>
    %cst_6 = arith.constant dense<0.000000e+00> : vector<16x128xf32>
    %11 = tpu.matmul %7, %10, %cst_6 {dimension_numbers = #tpu.dot_dimension_numbers<[0], [0], [1], [1], [0, 1, 1, 1], [], []>} : vector<128x16xbf16>, vector<128x128xbf16>, vector<16x128xf32> -> vector<16x128xf32>
    %12 = arith.addf %9, %11 : vector<16x128xf32>
    %c0_7 = arith.constant 0 : index
    %c0_8 = arith.constant 0 : index
    %13 = vector.load %arg4[%c0_7, %c0_8] : memref<16x128xf32, #tpu.memory_space<vmem>>, vector<16x128xf32>
    tpu.vector_store %arg4[%c0_7, %c0_8], %12 {strides = array<i32>} : memref<16x128xf32, #tpu.memory_space<vmem>>, vector<16x128xf32>,
    return
  }
  func.func @transform_0(%arg0: i32) -> (i32, i32, i32) {
    %c0_i32 = arith.constant 0 : i32
    %c0_i32_0 = arith.constant 0 : i32
    %c0_i32_1 = arith.constant 0 : i32
    return %arg0, %c0_i32, %c0_i32_0 : i32, i32, i32
  }
  func.func @transform_1(%arg0: i32) -> (i32, i32) {
    %c0_i32 = arith.constant 0 : i32
    %c0_i32_0 = arith.constant 0 : i32
    %c0_i32_1 = arith.constant 0 : i32
    return %c0_i32, %c0_i32_0 : i32, i32
  }
  func.func @transform_2(%arg0: i32) -> (i32, i32) {
    %c0_i32 = arith.constant 0 : i32
    %c0_i32_0 = arith.constant 0 : i32
    %c0_i32_1 = arith.constant 0 : i32
    return %c0_i32, %c0_i32_0 : i32, i32
  }
  func.func @transform_3(%arg0: i32) -> (i32, i32) {
    %c0_i32 = arith.constant 0 : i32
    %c0_i32_0 = arith.constant 0 : i32
    return %arg0, %c0_i32 : i32, i32
  }
}

</mosaic_0001>

<bundles_post_ra>
// kernel: tpu_custom_call.1
= control target key start
LH: loop header
LB: loop body
LE: loop exit
PB: predicated region body
PF: predicated region fallthrough
CT: control target
= control target key end

     0   :  { %8 = vsyncpa [#allocation3], 0  ;;  %s746_s0 = inlined_call_operand.hbm [shape: s32[1,1,16], index: 0, kind: input, shape index: {}]   ;;  %s747_s1 = inlined_call_operand.hbm [shape: bf16[128,128], index: 1, kind: input, shape index: {}]   ;;  %s748_s2 = inlined_call_operand.hbm [shape: bf16[128,128], index: 2, kind: input, shape index: {}]   ;;  %s749_s3 = inlined_call_operand.hbm [shape: f32[16,128], index: 3, kind: output, shape index: {}]  }
   0x1   :  { %9 = vsyncpa [#allocation6], 0 }
   0x2   :  { %10 = vsyncpa [#allocation4], 0  ;;  %s592_s12 = smov [#allocation5]   ;;  %s498_s16 = scalar_lea.hbm %s747_s1, 1024 }
   0x3   :  { %s26_s13 = sshll.u32 %s592_s12, 4  ;;  %p499_p0 = scmp.ne.s32.totalorder %s747_s1, %s498_s16  ;;  %s27_s13 = int_to_ptr.vmem [resolvable:$true] %s26_s13 }
   0x4   :  { %p502_p1 = scmp.lt.u32.totalorder %s498_s16, %s747_s1 }
   0x6   :  { %p504_p2 = pnand %p502_p1, %p499_p0 }
   0x8   :  { %507 = shalt.err (!%p504_p2)
}
   0x9   :  { %s508_s21 = scalar_lea.vmem %s27_s13, 1024  ;;  %p513_p4 = scmp.lt.s32.totalorder %s27_s13, %s27_s13 }
   0xa   :  { %p509_p3 = scmp.ne.s32.totalorder %s27_s13, %s508_s21  ;;  %p514_p5 = scmp.lt.s32.totalorder %s508_s21, %s508_s21 }
   0xc   :  { %p515_p6 = por %p514_p5, %p513_p4 }
   0xe   :  { %p516_p7 = pnand %p515_p6, %p509_p3 }
  0x10   :  { %519 = shalt.err (!%p516_p7)
}
  0x11   :  { %s593_s22 = smov 64   ;;  %s594_s23 = smov 4  }
  0x12   :  { %32 = dma.hbm_to_vmem [thread:$0]  %s747_s1, 1024, %s27_s13, [#allocation6], %s593_s22, %s593_s22, %s594_s23  }
  0x13   :  { %s595_s26 = smov [#allocation2]   ;;  %s596_s28 = smov [#allocation7]  }
  0x14   :  { %s17_s27 = sshll.u32 %s595_s26, 4  ;;  %s38_s29 = sshll.u32 %s596_s28, 4  ;;  %s18_s27 = int_to_ptr.vmem [resolvable:$true] %s17_s27  ;;  %s39_s29 = int_to_ptr.vmem [resolvable:$true] %s38_s29 }
  0x15   :  { %s520_s5 = scalar_lea.hbm %s746_s0, 16 }
  0x16   :  { %p521_p8 = scmp.ne.s32.totalorder %s746_s0, %s520_s5  ;;  %p524_p9 = scmp.lt.u32.totalorder %s520_s5, %s746_s0 }
  0x18   :  { %p526_p10 = pnand %p524_p9, %p521_p8 }
  0x1a   :  { %529 = shalt.err (!%p526_p10)
}
  0x1b   :  { %s530_s1 = scalar_lea.vmem %s18_s27, 16  ;;  %s534_s10 = scalar_lea.vmem %s18_s27, 32 }
  0x1c   :  { %p531_p11 = scmp.ne.s32.totalorder %s18_s27, %s530_s1  ;;  %p535_p12 = scmp.lt.s32.totalorder %s18_s27, %s18_s27 }
  0x1d   :  { %p536_p13 = scmp.lt.s32.totalorder %s534_s10, %s530_s1 }
  0x1f   :  { %p537_p0 = por %p536_p13, %p535_p12 }
  0x21   :  { %p538_p1 = pnand %p537_p0, %p531_p11 }
  0x23   :  { %541 = shalt.err (!%p538_p1)
}
  0x24   :  { %20 = dma.hbm_to_vmem [thread:$0]  %s746_s0, 16, %s18_s27, [#allocation3]  }
  0x25   :  { %s542_s15 = scalar_lea.hbm %s748_s2, 1024 }
  0x26   :  { %p543_p2 = scmp.ne.s32.totalorder %s748_s2, %s542_s15  ;;  %p546_p3 = scmp.lt.u32.totalorder %s542_s15, %s748_s2 }
  0x28   :  { %p548_p4 = pnand %p546_p3, %p543_p2 }
  0x2a   :  { %551 = shalt.err (!%p548_p4)
}
  0x2b   :  { %s552_s20 = scalar_lea.vmem %s39_s29, 1024  ;;  %p557_p6 = scmp.lt.s32.totalorder %s39_s29, %s39_s29 }
  0x2c   :  { %p553_p5 = scmp.ne.s32.totalorder %s39_s29, %s552_s20  ;;  %p558_p7 = scmp.lt.s32.totalorder %s552_s20, %s552_s20 }
  0x2e   :  { %p559_p8 = por %p558_p7, %p557_p6 }
  0x30   :  { %p560_p9 = pnand %p559_p8, %p553_p5 }
  0x32   :  { %563 = shalt.err (!%p560_p9)
}
  0x33   :  { %44 = dma.hbm_to_vmem [thread:$0]  %s748_s2, 1024, %s39_s29, [#allocation6], %s593_s22, %s593_s22, %s594_s23  }
  0x34   :  { %586 = dma.done.wait [#allocation3], 16  }
  0x35   :  { %587 = vsyncadd [#allocation3], 4294967280 }
  0x36   :  { %588 = dma.done.wait [#allocation6], 2048  }
  0x37   :  { %589 = vsyncadd [#allocation6], 4294965248  ;;  %v56_v0 = vlaneseq  ;;  %v597_v1 = vmov 0.0   ;;  %vm598_vm0 = vmmov 0   ;;  %v675_v8 = vld [vmem:[#allocation2] ss:$0 sm:$0xff] }
  0x38   :  { %430 = vmatprep.subr.bf16.mxu1 %v597_v1  ;;  %450 = vmatprep.subr.bf16.mxu0 %v597_v1  ;;  %v482_v10 = vld [vmem:[#allocation7] sm:$0xff]   ;;  %v484_v18 = vld [vmem:[#allocation7 + $0x8] sm:$0xff]   ;;  %v486_v24 = vld [vmem:[#allocation7 + $0x10] sm:$0xff]   ;;  %s599_s2 = smov [#allocation8]  }
  0x39   :  { %v666_v2 = vshrl.u32 %v56_v0, 7  ;;  %446 = vmatprep.mubr.msk.bf16.mxu1 %vm598_vm0, %v597_v1  ;;  %466 = vmatprep.mubr.msk.bf16.mxu0 %vm598_vm0, %v597_v1  ;;  %v483_v17 = vld [vmem:[#allocation5] sm:$0xff]   ;;  %v485_v22 = vld [vmem:[#allocation5 + $0x8] sm:$0xff]   ;;  %v487_v28 = vld [vmem:[#allocation5 + $0x10] sm:$0xff]   ;;  %s366_s22 = sshll.u32 %s599_s2, 4  ;;  %s367_s22 = int_to_ptr.vmem [resolvable:$true] %s366_s22 }
  0x3a   :  { %431 = vmatpush3.bf16.msra.mxu1 %v482_v10  ;;  %451 = vmatpush3.bf16.msra.mxu0 %v483_v17  ;;  %v488_v30 = vld [vmem:[#allocation7 + $0x18] sm:$0xff]   ;;  %v490_v37 = vld [vmem:[#allocation7 + $0x20] sm:$0xff]   ;;  %v492_v44 = vld [vmem:[#allocation7 + $0x28] sm:$0xff]   ;;  %s564_s23 = scalar_lea.vmem %s367_s22, 256  ;;  %p569_p11 = scmp.lt.s32.totalorder %s367_s22, %s367_s22 }
  0x3b   :  { %v58_v3 = vadd.s32 8, %v666_v2  ;;  %v59_v4 = vadd.s32 16, %v666_v2  ;;  %v60_v5 = vadd.s32 24, %v666_v2  ;;  %v61_v6 = vadd.s32 32, %v666_v2  ;;  %432 = vmatprep.subr.bf16.mxu1 %v597_v1  ;;  %452 = vmatprep.subr.bf16.mxu0 %v597_v1  ;;  %v489_v35 = vld [vmem:[#allocation5 + $0x18] sm:$0xff]   ;;  %v491_v41 = vld [vmem:[#allocation5 + $0x20] sm:$0xff]   ;;  %p565_p10 = scmp.ne.s32.totalorder %s367_s22, %s564_s23  ;;  %p570_p12 = scmp.lt.s32.totalorder %s564_s23, %s564_s23 }
  0x3c   :  { %v62_v7 = vadd.s32 40, %v666_v2  ;;  %v63_v9 = vadd.s32 48, %v666_v2  ;;  %vm77_vm1 = vcmp.eq.s32.totalorder %v666_v2, %v675_v8  ;;  %v64_v16 = vadd.s32 56, %v666_v2  ;;  %v493_v48 = vld [vmem:[#allocation5 + $0x28] sm:$0xff]   ;;  %v494_v51 = vld [vmem:[#allocation7 + $0x30] sm:$0xff]   ;;  %v496_v56 = vld [vmem:[#allocation7 + $0x38] sm:$0xff]  }
  0x3d   :  { %vm78_vm2 = vcmp.eq.s32.totalorder %v58_v3, %v675_v8  ;;  %vm79_vm3 = vcmp.eq.s32.totalorder %v59_v4, %v675_v8  ;;  %vm80_vm4 = vcmp.eq.s32.totalorder %v60_v5, %v675_v8  ;;  %v380_v11 = vsel %vm77_vm1, 1.0, %v597_v1  ;;  %v495_v53 = vld [vmem:[#allocation5 + $0x30] sm:$0xff]   ;;  %v497_v58 = vld [vmem:[#allocation5 + $0x38] sm:$0xff]   ;;  %p571_p13 = por %p570_p12, %p569_p11 }
  0x3e   :  { %v381_v12 = vsel %vm78_vm2, 1.0, %v597_v1  ;;  %v382_v13 = vsel %vm79_vm3, 1.0, %v597_v1  ;;  %v383_v14 = vsel %vm80_vm4, 1.0, %v597_v1  ;;  %vm81_vm5 = vcmp.eq.s32.totalorder %v61_v6, %v675_v8  ;;  %433 = vmatpush3.bf16.msra.mxu1 %v484_v18  ;;  %453 = vmatpush3.bf16.msra.mxu0 %v485_v22 }
  0x3f   :  { %v125_v15 = vpack.c.bf16 %v381_v12, %v380_v11  ;;  %vm82_vm6 = vcmp.eq.s32.totalorder %v62_v7, %v675_v8  ;;  %v126_v19 = vpack.c.bf16 %v383_v14, %v382_v13  ;;  %v384_v20 = vsel %vm81_vm5, 1.0, %v597_v1  ;;  %434 = vmatprep.subr.bf16.mxu1 %v597_v1  ;;  %454 = vmatprep.subr.bf16.mxu0 %v597_v1  ;;  %p572_p0 = pnand %p571_p13, %p565_p10 }
  0x40   :  { %v65_v21 = vadd.s32 64, %v666_v2  ;;  %v385_v23 = vsel %vm82_vm6, 1.0, %v597_v1  ;;  %vm83_vm7 = vcmp.eq.s32.totalorder %v63_v9, %v675_v8  ;;  %vm84_vm8 = vcmp.eq.s32.totalorder %v64_v16, %v675_v8 }
  0x41   :  { %165 = vxpose.xlu0.c.b16.start [1/8] (narrow) %v125_v15, 16  ;;  %v66_v25 = vadd.s32 72, %v666_v2  ;;  %v127_v26 = vpack.c.bf16 %v385_v23, %v384_v20  ;;  %v386_v27 = vsel %vm83_vm7, 1.0, %v597_v1  ;;  %v387_v29 = vsel %vm84_vm8, 1.0, %v597_v1 }
  0x42   :  { %vm85_vm9 = vcmp.eq.s32.totalorder %v65_v21, %v675_v8  ;;  %435 = vmatpush3.bf16.msra.mxu1 %v486_v24  ;;  %v67_v31 = vadd.s32 80, %v666_v2  ;;  %v68_v32 = vadd.s32 88, %v666_v2  ;;  %v128_v34 = vpack.c.bf16 %v387_v29, %v386_v27  ;;  %455 = vmatpush3.bf16.msra.mxu0 %v487_v28 }
  0x43   :  { %vm86_vm10 = vcmp.eq.s32.totalorder %v66_v25, %v675_v8  ;;  %436 = vmatprep.subr.bf16.mxu1 %v597_v1  ;;  %v388_v33 = vsel %vm85_vm9, 1.0, %v597_v1  ;;  %456 = vmatprep.subr.bf16.mxu0 %v597_v1  ;;  %v69_v38 = vadd.s32 96, %v666_v2  ;;  %v70_v39 = vadd.s32 104, %v666_v2 }
  0x44   :  { %v389_v36 = vsel %vm86_vm10, 1.0, %v597_v1  ;;  %vm87_vm11 = vcmp.eq.s32.totalorder %v67_v31, %v675_v8  ;;  %vm88_vm12 = vcmp.eq.s32.totalorder %v68_v32, %v675_v8  ;;  %v71_v45 = vadd.s32 112, %v666_v2 }
  0x45   :  { %166 = vxpose.xlu0.c.b16.cont [2/8] (narrow) %v126_v19, 16  ;;  %v129_v40 = vpack.c.bf16 %v389_v36, %v388_v33  ;;  %v390_v42 = vsel %vm87_vm11, 1.0, %v597_v1  ;;  %v391_v43 = vsel %vm88_vm12, 1.0, %v597_v1  ;;  %vm89_vm13 = vcmp.eq.s32.totalorder %v69_v38, %v675_v8 }
  0x46   :  { %437 = vmatpush3.bf16.msra.mxu1 %v488_v30  ;;  %457 = vmatpush3.bf16.msra.mxu0 %v489_v35  ;;  %vm90_vm14 = vcmp.eq.s32.totalorder %v70_v39, %v675_v8  ;;  %v72_v46 = vadd.s32 120, %v666_v2  ;;  %v130_v47 = vpack.c.bf16 %v391_v43, %v390_v42  ;;  %v392_v49 = vsel %vm89_vm13, 1.0, %v597_v1 }
  0x47   :  { %438 = vmatprep.subr.bf16.mxu1 %v597_v1  ;;  %458 = vmatprep.subr.bf16.mxu0 %v597_v1  ;;  %v393_v50 = vsel %vm90_vm14, 1.0, %v597_v1  ;;  %vm91_vm15 = vcmp.eq.s32.totalorder %v71_v45, %v675_v8 }
  0x48   :  { %vm92_vm0 = vcmp.eq.s32.totalorder %v72_v46, %v675_v8  ;;  %v131_v52 = vpack.c.bf16 %v393_v50, %v392_v49  ;;  %v394_v54 = vsel %vm91_vm15, 1.0, %v597_v1 }
  0x49   :  { %167 = vxpose.xlu0.c.b16.cont [3/8] (narrow) %v127_v26, 16  ;;  %v395_v55 = vsel %vm92_vm0, 1.0, %v597_v1 }
  0x4a   :  { %439 = vmatpush3.bf16.msra.mxu1 %v490_v37  ;;  %459 = vmatpush3.bf16.msra.mxu0 %v491_v41  ;;  %v132_v57 = vpack.c.bf16 %v395_v55, %v394_v54 }
  0x4b   :  { %440 = vmatprep.subr.bf16.mxu1 %v597_v1  ;;  %460 = vmatprep.subr.bf16.mxu0 %v597_v1 }
  0x4d   :  { %168 = vxpose.xlu0.c.b16.cont [4/8] (narrow) %v128_v34, 16 }
  0x4e   :  { %441 = vmatpush3.bf16.msra.mxu1 %v492_v44  ;;  %461 = vmatpush3.bf16.msra.mxu0 %v493_v48 }
  0x4f   :  { %442 = vmatprep.subr.bf16.mxu1 %v597_v1  ;;  %462 = vmatprep.subr.bf16.mxu0 %v597_v1 }
  0x51   :  { %169 = vxpose.xlu0.c.b16.cont [5/8] (narrow) %v129_v40, 16 }
  0x52   :  { %443 = vmatpush3.bf16.msra.mxu1 %v494_v51  ;;  %463 = vmatpush3.bf16.msra.mxu0 %v495_v53 }
  0x53   :  { %444 = vmatprep.subr.bf16.mxu1 %v597_v1  ;;  %464 = vmatprep.subr.bf16.mxu0 %v597_v1 }
  0x55   :  { %170 = vxpose.xlu0.c.b16.cont [6/8] (narrow) %v130_v47, 16 }
  0x56   :  { %445 = vmatpush3.bf16.msra.mxu1 %v496_v56  ;;  %465 = vmatpush3.bf16.msra.mxu0 %v497_v58 }
  0x59   :  { %171 = vxpose.xlu0.c.b16.cont [7/8] (narrow) %v131_v52, 16 }
  0x5d   :  { %172 = vxpose.xlu0.c.b16.end [8/8] (narrow) %v132_v57, 16 }
  0xa7   :  { %v173_v59 = vpop.trf.xlu0 }
  0xa8   :  { %447 = vmatmul.mubr.bf16.vlgmr.msra.gmra.mrb[0].mxu1 %v173_v59  ;;  %467 = vmatmul.mubr.bf16.vlgmr.msra.gmra.mrb[0].mxu0 %v173_v59 }
 0x17b   :  { %v263_v60 = vpop.f32.mrb[0].mxu1  ;;  %v352_v61 = vpop.f32.mrb[0].mxu0 }
 0x17c   :  { %v353_v62 = vadd.f32 %v352_v61, %v263_v60  ;;  %v448_v63 = vpop.f32.mrb[1].mxu1  ;;  %v468_v0 = vpop.f32.mrb[1].mxu0 }
 0x17d   :  { %v266_v2 = vpop.f32.mrb[2].mxu1  ;;  %v355_v3 = vpop.f32.mrb[2].mxu0 }
 0x17e   :  { %359 = vst [vmem:[#allocation8] sm:$0xff] %v353_v62  ;;  %v356_v4 = vadd.f32 %v355_v3, %v266_v2  ;;  %v449_v5 = vpop.f32.mrb[3].mxu1  ;;  %v469_v1 = vpop.f32.mrb[3].mxu0 }
 0x180   :  { %360 = vst [vmem:[#allocation8 + $0x8] sm:$0xff] %v356_v4 }
 0x181   :  { %575 = shalt.err (!%p572_p0)
}
 0x182   :  { %s576_s26 = scalar_lea.hbm %s749_s3, 256 }
 0x183   :  { %p577_p1 = scmp.ne.s32.totalorder %s749_s3, %s576_s26  ;;  %p580_p2 = scmp.lt.u32.totalorder %s576_s26, %s749_s3 }
 0x185   :  { %p582_p3 = pnand %p580_p2, %p577_p1 }
 0x187   :  { %585 = shalt.err (!%p582_p3)
}
 0x188   :  { %s600_s4 = smov 128   ;;  %s601_s5 = smov 8  }
 0x189   :  { %372 = dma.vmem_to_hbm [thread:$0]  %s367_s22, 256, %s749_s3, [#allocation4], %s600_s4, %s600_s4, %s601_s5  }
 0x18a   :  { %590 = dma.done.wait [#allocation4], 256  }
 0x18b   :  { %591 = vsyncadd [#allocation4], 4294967040 }
 0x18c   :  { %376 = vsyncpa [#allocation3], 1 }
 0x18d   :  { %377 = vsyncpa [#allocation6], 1 }
 0x18e   :  { %378 = vsyncpa [#allocation4], 1 }

</bundles_post_ra>
